<compile_context>
chip_gen: v6e
topology: v6e:2x2x1
jax: 0.10.0
libtpu: 0.0.40
codegen_flags: <defaults>
</compile_context>

<pallas_src>
import jax
import jax.numpy as jnp
from jax.experimental import pallas as pl
from jax.experimental.pallas import tpu as pltpu


def conv_bn_kernel(x_ref, w_ref, shift_ref, y_ref):
    # x_ref: (1, C_in, T) compute dtype; w_ref: (C_out, C_in) compute dtype;
    # shift_ref: (C_out, 1) f32; y_ref: (1, C_out, T) out dtype.
    y = jnp.dot(w_ref[...], x_ref[0],                      # single MXU push, f32 accumulate
                preferred_element_type=jnp.float32)
    y_ref[0] = (y + shift_ref[...]).astype(y_ref.dtype)    # folded (conv-bias + BN) shift


def _round_up(v, m):
    return -(-v // m) * m


_VMEM_TILE_BUDGET = 36 * 1024 * 1024   # tiles+weights target; leaves headroom inside v7x's 64 MiB
_MIN_LANE_TILE = 512                   # <512 lanes: ~29% of HBM roofline + 0.35us/step overhead
_MAX_LANE_TILE = 16384                 # diminishing returns past ~1-2k lanes; keeps DMAs reasonable


def _pick_hw_tile(hw, batch, c_in, c_out, x_bytes, y_bytes, w_bytes):
    """Channel- and VMEM-budget-aware lane tile (multiple of 128, or the full HW extent)."""
    # Weight + shift are grid-invariant but the auto-pipeline still double-buffers them; the bf16
    # weight cast halves that cost, and it is charged against the budget here.
    const_bytes = 2 * (c_out * c_in * w_bytes + c_out * 4)
    per_lane = 2 * (c_in * x_bytes + c_out * y_bytes)       # double-buffered x and y tiles, per lane
    budget = max(_VMEM_TILE_BUDGET - const_bytes, 128 * per_lane)
    t_cap = min(_MAX_LANE_TILE, max(128, (budget // per_lane) // 128 * 128))

    if hw <= t_cap:
        if batch < 2 and hw >= 2 * _MIN_LANE_TILE:
            # v7x has two TensorCores: split so the parallel grid has >= 2 steps, without dropping
            # below the bandwidth-efficient minimum tile.
            return _round_up(pl.cdiv(hw, 2), 128)
        return hw                       # full extent: always a legal block shape
    return t_cap                        # 128-multiple, >= 512 lanes for any sane channel count


def conv_residual_forward(x, params, eps=1e-5,
                          compute_dtype=jnp.bfloat16, out_dtype=jnp.float32):
    """Forward of conv_residual: BatchNorm2d(Conv2d(x)) with module defaults kernel_size=1,
    stride=1. BN is applied in eval mode (running stats) and folded into the conv; the module's
    self.relu is never applied in forward, so it is omitted here too."""
    # TODO(synk): only the module-default kernel_size=1 / stride=1 path is implemented; training-mode
    # BatchNorm (batch statistics + running-stat update) has no clean single-kernel equivalent here.
    B, C_in, H, W = x.shape
    w = params["conv_w"]                                    # (C_out, C_in, 1, 1)
    C_out = w.shape[0]

    # One-time fold on tiny constant arrays: scale*(Wx + b - mean) + beta == (scale*W)x + shift.
    scale = params["bn_gamma"] / jnp.sqrt(params["bn_var"] + eps)               # (C_out,)
    w_folded = (w[:, :, 0, 0] * scale[:, None]).astype(compute_dtype)           # (C_out, C_in)
    shift = (scale * (params["conv_b"] - params["bn_mean"])
             + params["bn_beta"]).reshape(C_out, 1).astype(jnp.float32)         # (C_out, 1), exact

    HW = H * W
    x_bytes = jnp.dtype(compute_dtype).itemsize
    y_bytes = jnp.dtype(out_dtype).itemsize
    t_hw = _pick_hw_tile(HW, B, C_in, C_out, x_bytes, y_bytes, x_bytes)
    n_hw = pl.cdiv(HW, t_hw)                                 # ragged last block handled by Pallas

    x_flat = x.reshape(B, C_in, HW).astype(compute_dtype)    # contiguous reshape; bf16 halves reads

    # Explicit VMEM limit sized from the actual resident tiles (+ headroom), capped well below
    # v7x's 64 MiB physical VMEM; avoids both the 16 MiB (v5e) / 32 MiB (v6e/v7x) scoped defaults
    # choking the pipeline and oversized requests failing on v7x.
    tile_bytes = 2 * t_hw * (C_in * x_bytes + C_out * y_bytes)
    const_bytes = 2 * (C_out * C_in * x_bytes + C_out * 4)
    vmem_limit = min(max(int(1.25 * (tile_bytes + const_bytes)) + (4 << 20), 32 << 20), 56 << 20)

    flops = 2 * B * HW * C_in * C_out
    bytes_accessed = (B * HW * C_in * x_bytes            # read x
                      + C_out * C_in * x_bytes + C_out * 4   # read weight + shift
                      + B * HW * C_out * y_bytes)         # write y

    y_flat = pl.pallas_call(
        conv_bn_kernel,
        out_shape=jax.ShapeDtypeStruct((B, C_out, HW), out_dtype),
        grid_spec=pltpu.PrefetchScalarGridSpec(
            num_scalar_prefetch=0,
            grid=(B, n_hw),
            in_specs=[
                pl.BlockSpec((1, C_in, t_hw), lambda b, s: (b, 0, s)),
                pl.BlockSpec((C_out, C_in), lambda b, s: (0, 0)),
                pl.BlockSpec((C_out, 1), lambda b, s: (0, 0)),
            ],
            out_specs=pl.BlockSpec((1, C_out, t_hw), lambda b, s: (b, 0, s)),
        ),
        compiler_params=pltpu.CompilerParams(
            dimension_semantics=("parallel", "parallel"),
            vmem_limit_bytes=vmem_limit),
        cost_estimate=pl.CostEstimate(flops=flops, transcendentals=0,
                                      bytes_accessed=bytes_accessed),
    )(x_flat, w_folded, shift)
    return y_flat.reshape(B, C_out, H, W)


# ---------------- pure-JAX reference (un-fused conv -> eval BN, fp32) ----------------
def conv_residual_ref(x, params, eps=1e-5):
    w = params["conv_w"][:, :, 0, 0]                         # (C_out, C_in)
    y = jnp.einsum("oi,bihw->bohw", w, x,
                   precision=jax.lax.Precision.HIGHEST)
    y = y + params["conv_b"][None, :, None, None]
    scale = params["bn_gamma"] / jnp.sqrt(params["bn_var"] + eps)
    return ((y - params["bn_mean"][None, :, None, None]) * scale[None, :, None, None]
            + params["bn_beta"][None, :, None, None])


def make_params(key, c_in, c_out):
    ks = jax.random.split(key, 5)
    # conv_init: kaiming_normal_(mode='fan_out') for a 1x1 conv -> std = sqrt(2 / C_out); bias = 0.
    conv_w = jnp.sqrt(2.0 / c_out) * jax.random.normal(ks[0], (c_out, c_in, 1, 1), jnp.float32)
    conv_b = jnp.zeros((c_out,), jnp.float32)
    # bn_init(bn, 1) gives gamma=1, beta=0 at init; use "trained-looking" values so the BN fold
    # is actually exercised by the correctness check.
    gamma = 1.0 + 0.1 * jax.random.normal(ks[1], (c_out,), jnp.float32)
    beta = 0.1 * jax.random.normal(ks[2], (c_out,), jnp.float32)
    mean = 0.1 * jax.random.normal(ks[3], (c_out,), jnp.float32)
    var = 1.0 + 0.1 * jnp.abs(jax.random.normal(ks[4], (c_out,), jnp.float32))
    return dict(conv_w=conv_w, conv_b=conv_b,
                bn_gamma=gamma, bn_beta=beta, bn_mean=mean, bn_var=var)


if __name__ == "__main__":
    key = jax.random.PRNGKey(0)
    kx, kp = jax.random.split(key)

    B, C_in, C_out, H, W = 2, 4, 8, 16, 16
    x = jax.random.normal(kx, (B, C_in, H, W), jnp.float32)
    params = make_params(kp, C_in, C_out)

    y = jax.block_until_ready(conv_residual_forward(x, params))
    y_ref = conv_residual_ref(x, params)

    assert y.shape == (B, C_out, H, W)
    assert y.dtype == jnp.float32
    # bf16 operands with f32 accumulation vs. the fp32 reference -> bf16-level tolerance.
    assert jnp.allclose(y, y_ref, atol=1e-1, rtol=2e-2), float(jnp.max(jnp.abs(y - y_ref)))

    print("KERNEL_OK")
</pallas_src>

<mosaic_0001>
module attributes {stable_mosaic.version = 11 : i64} {
  func.func @conv_bn_kernel(%arg0: i32, %arg1: i32, %arg2: memref<1x4x256xbf16, #tpu.memory_space<vmem>>, %arg3: memref<8x4xbf16, #tpu.memory_space<vmem>>, %arg4: memref<8x1xf32, #tpu.memory_space<vmem>>, %arg5: memref<1x8x256xf32, #tpu.memory_space<vmem>>) attributes {dimension_semantics = [#tpu.dimension_semantics<parallel>, #tpu.dimension_semantics<parallel>], iteration_bounds = array<i64: 2, 1>, scalar_prefetch = 0 : i64, scratch_operands = 0 : i64, tpu.core_type = #tpu.core_type<tc>, window_params = [{transform_indices = @transform_0, window_bounds = array<i64: 1, 4, 256>}, {pipeline_mode = #tpu.pipeline_mode<synchronous>, transform_indices = @transform_1, window_bounds = array<i64: 8, 4>}, {pipeline_mode = #tpu.pipeline_mode<synchronous>, transform_indices = @transform_2, window_bounds = array<i64: 8, 1>}, {transform_indices = @transform_3, window_bounds = array<i64: 1, 8, 256>}]} {
    %c0 = arith.constant 0 : index
    %c0_0 = arith.constant 0 : index
    %0 = vector.load %arg3[%c0, %c0_0] : memref<8x4xbf16, #tpu.memory_space<vmem>>, vector<8x4xbf16>
    %c0_1 = arith.constant 0 : index
    %c0_2 = arith.constant 0 : index
    %c0_3 = arith.constant 0 : index
    %1 = vector.load %arg2[%c0_1, %c0_2, %c0_3] : memref<1x4x256xbf16, #tpu.memory_space<vmem>>, vector<1x4x256xbf16>
    %2 = vector.shape_cast %1 : vector<1x4x256xbf16> to vector<4x256xbf16>
    %cst = arith.constant dense<0.000000e+00> : vector<8x256xf32>
    %3 = tpu.matmul %0, %2, %cst {dimension_numbers = #tpu.dot_dimension_numbers<[1], [0], [0], [1], [0, 0, 1, 1], [], []>} : vector<8x4xbf16>, vector<4x256xbf16>, vector<8x256xf32> -> vector<8x256xf32>
    %c0_4 = arith.constant 0 : index
    %c0_5 = arith.constant 0 : index
    %4 = vector.load %arg4[%c0_4, %c0_5] : memref<8x1xf32, #tpu.memory_space<vmem>>, vector<8x1xf32>
    %5 = vector.broadcast %4 : vector<8x1xf32> to vector<8x256xf32>
    %6 = arith.addf %3, %5 : vector<8x256xf32>
    %c0_6 = arith.constant 0 : index
    %c0_7 = arith.constant 0 : index
    %c0_8 = arith.constant 0 : index
    %7 = vector.load %arg5[%c0_6, %c0_7, %c0_8] : memref<1x8x256xf32, #tpu.memory_space<vmem>>, vector<1x8x256xf32>
    %8 = vector.shape_cast %7 : vector<1x8x256xf32> to vector<8x256xf32>
    %9 = vector.shape_cast %6 : vector<8x256xf32> to vector<1x8x256xf32>
    tpu.vector_store %arg5[%c0_6, %c0_7, %c0_8], %9 {strides = array<i32>} : memref<1x8x256xf32, #tpu.memory_space<vmem>>, vector<1x8x256xf32>,
    return
  }
  func.func @transform_0(%arg0: i32, %arg1: i32) -> (i32, i32, i32) {
    %c0_i32 = arith.constant 0 : i32
    %c0_i32_0 = arith.constant 0 : i32
    return %arg0, %c0_i32, %arg1 : i32, i32, i32
  }
  func.func @transform_1(%arg0: i32, %arg1: i32) -> (i32, i32) {
    %c0_i32 = arith.constant 0 : i32
    %c0_i32_0 = arith.constant 0 : i32
    %c0_i32_1 = arith.constant 0 : i32
    return %c0_i32, %c0_i32_0 : i32, i32
  }
  func.func @transform_2(%arg0: i32, %arg1: i32) -> (i32, i32) {
    %c0_i32 = arith.constant 0 : i32
    %c0_i32_0 = arith.constant 0 : i32
    %c0_i32_1 = arith.constant 0 : i32
    return %c0_i32, %c0_i32_0 : i32, i32
  }
  func.func @transform_3(%arg0: i32, %arg1: i32) -> (i32, i32, i32) {
    %c0_i32 = arith.constant 0 : i32
    %c0_i32_0 = arith.constant 0 : i32
    return %arg0, %c0_i32, %arg1 : i32, i32, i32
  }
}

</mosaic_0001>

<bundles_post_ra>
// kernel: tpu_custom_call.1
= control target key start
LH: loop header
LB: loop body
LE: loop exit
PB: predicated region body
PF: predicated region fallthrough
CT: control target
= control target key end

     0   :  { %8 = vsyncpa [#allocation3], 0  ;;  %s657_s0 = inlined_call_operand.vmem [shape: bf16[2,4,256], index: 0, kind: input, shape index: {}]   ;;  %s658_s1 = inlined_call_operand.vmem [shape: bf16[8,4], index: 1, kind: input, shape index: {}]   ;;  %s659_s2 = inlined_call_operand.vmem [shape: f32[8,1], index: 2, kind: input, shape index: {}]   ;;  %s660_s3 = inlined_call_operand.hbm [shape: f32[2,8,256], index: 3, kind: output, shape index: {}]  }
   0x1   :  { %10 = vsyncpa [#allocation3 + $0x1], 0  ;;  %s540_s12 = smov 0   ;;  %s542_s13 = smov 0  }
   0x2   :  { %s544_s14 = smov 0   ;;  %s546_s15 = smov 0  }
   0x3   :  { %s548_s16 = smov 0   ;;  %s550_s17 = smov 0  }
   0x4 LB: > { %s365_s18 = sadd.s32 4294967295, %s516_s17   ;;  %s366_s19 = sadd.s32 4294967294, %s516_s17   ;;  %s516_s17 = sphi %s550_s17, %s16_s17   ;;  %s512_s16 = sphi %s548_s16, %s667_s16   ;;  %s508_s15 = sphi %s546_s15, %s666_s15   ;;  %s504_s14 = sphi %s544_s14, %s665_s14   ;;  %s500_s13 = sphi %s542_s13, %s664_s13   ;;  %s496_s12 = sphi %s540_s12, %s663_s12  }
   0x5   : > { %s28_s20 = sadd.s32 1, %s512_s16  ;;  %s107_s21 = sadd.s32 1, %s504_s14 }
   0x6   : > { %p30_p0 = scmp.ge.s32.totalorder %s28_s20, 2  ;;  %p117_p1 = scmp.ne.s32.totalorder %s504_s14, %s500_s13 }
   0x7   : > { %p118_p2 = scmp.eq.s32.totalorder %s365_s18, 1  ;;  %p123_p3 = scmp.ne.s32.totalorder %s500_s13, %s496_s12 }
   0x8   : > { %s669_s20 = smov (%p30_p0, %s28_s20), 0  ;;  %p124_p5 = scmp.eq.s32.totalorder %s366_s19, 1 }
   0x9   : > { %p580_p4 = por %p118_p2, %p117_p1  ;;  %s102_s23 = ssub.s32 %s512_s16, %s669_s20 }
   0xa   : > { %p369_p6 = scmp.ge.s32.totalorder %s516_s17, 1  ;;  %p105_p7 = scmp.eq.s32.totalorder %s102_s23, 0 }
   0xb   : > { %p587_p8 = por %p124_p5, %p123_p3  ;;  %p161_p9 = scmp.lt.s32.totalorder %s516_s17, 3 }
   0xc   : > { %s593_s25 = scalar_select %p105_p7, %s504_s14, %s107_s21  }
   0xd   : > { %p162_p10 = pnand %p369_p6, %p161_p9 }
   0xe   : > { %p190_p11 = scmp.lt.s32.totalorder (!%p162_p10), %s508_s15, 1  ;;  %s186_s8 = sand.u32 (!%p162_p10), 1, %s500_s13  }
   0xf   : > { %165 = sbr.rel (%p162_p10) target bundleno = 242 (0xf2), region = 32  ;;  %s370_s9 = sshll.u32 (!%p162_p10), %s186_s8, 4 }
  0x10   : > { %s382_s10 = sshll.u32 (!%p162_p10), %s508_s15, 8  ;;  %s188_s11 = scalar_lea.vmem (!%p162_p10), [#allocation2], %s370_s9 }
  0x11   : > { %s289_s18 = sshll.u32 (!%p162_p10), %s188_s11, 4  ;;  %s611_s23 = scalar_lea.hbm (!%p162_p10), %s660_s3, %s382_s10  ;;  %s613_s18 = int_to_ptr.vmem [resolvable:$true] %s289_s18 }
  0x12   : > { %s440_s26 = scalar_lea.vmem (!%p162_p10), %s613_s18, 256  ;;  %s519_s27 = smov (!%p162_p10), [#allocation2]  }
  0x13   : > { %p441_p12 = scmp.ne.s32.totalorder (!%p162_p10), %s613_s18, %s440_s26 }
  0x14   : > { %v518_v0 = vmov 0   ;;  %v203_v1 = vld [vmem:[%s659_s2] sm:$0xff]  ;;  %s191_s28 = scalar_select %p190_p11, %s508_s15, 1  ;;  %vm222_vm0 = vcmask 1041408   ;;  %vm218_vm1 = vcmask 31744  }
  0x15   : > { %261 = vmatprep.mubr.bf16.mxu0 %v518_v0  ;;  %439 = vset.pattern.permute.xlu0 %v518_v0  ;;  %v201_v5 = vld [vmem:[%s658_s1] sm:$0xf]  ;;  %s273_s15 = scalar_lea.sflag [#allocation3], %s186_s8  ;;  %p442_p13 = pnand %p441_p12, %p580_p4 }
  0x16   : > { %206 = vperm.xlu0 %439, %v203_v1   ;;  %s381_s29 = sshll.u32 %s191_s28, 2  ;;  %s444_s28 = sshll.u32 %s519_s27, 4  ;;  %s445_s28 = int_to_ptr.vmem [resolvable:$false] %s444_s28 }
  0x17   : > { %s197_s5 = scalar_lea.vmem %s657_s0, %s381_s29  ;;  %p443_p0 = pneg %p442_p13 }
  0x18   : > { %v373_v2 = vld.sshfl [vmem:[%s197_s5] sm:$0x33 pattern:$0x76325410]  ;;  %s446_s29 = scalar_lea.vmem %s445_s28, 512  ;;  %p447_p1 = scmp.lt.s32.totalorder %s613_s18, %s445_s28 }
  0x19   : > { %v217_v3 = vcombine.high %v373_v2, %v373_v2  ;;  %v224_v4 = vsel %vm222_vm0, %v373_v2, 0  ;;  %p448_p2 = scmp.lt.s32.totalorder %s446_s29, %s440_s26 }
  0x1b   : > { %374 = vmatprep.subr.msk.bf16.mxu0 %vm222_vm0, %v217_v3  ;;  %p449_p3 = por %p448_p2, %p447_p1 }
  0x1c   : > { %244 = vmatpush1.bf16.msra.mxu0 %v224_v4 }
  0x1d   : > { %p450_p5 = pnand %p449_p3, %p443_p0 }
  0x1f   : > { %375 = vmatmul.mubr.msk.bf16.vlgmr.msra.gmra.mxu0 %vm218_vm1, %v201_v5 }
  0x91   : > { %v207_v6 = vpop.permute.xlu0 %206 }
  0xdf   : > { %v263_v7 = vpop.f32.mrf.mxu0 }
  0xe0   : > { %v264_v8 = vadd.f32 %v263_v7, %v207_v6 }
  0xe1   : > { %v265_v9 = vpop.f32.mrf.mxu0 }
  0xe2   : > { %270 = vst [vmem:[%s188_s11] sm:$0xff] %v264_v8  ;;  %v266_v10 = vadd.f32 %v265_v9, %v207_v6 }
  0xe3   : > { %v267_v11 = vpop.f32.mrf.mxu0 }
  0xe4   : > { %271 = vst [vmem:[%s188_s11 + $0x8] sm:$0xff] %v266_v10 }
  0xe5   : > { %v268_v12 = vpop.f32.mrf.mxu0 }
  0xe6   : > { %453 = shalt.err (!%p450_p5)
}
  0xe7   : > { %s454_s30 = scalar_lea.hbm %s611_s23, 256  ;;  %s458_s6 = scalar_lea.hbm %s660_s3, 512 }
  0xe8   : > { %p455_p6 = scmp.ne.s32.totalorder %s611_s23, %s454_s30  ;;  %p459_p10 = scmp.lt.s32.totalorder %s611_s23, %s660_s3 }
  0xe9   : > { %p460_p11 = scmp.lt.s32.totalorder %s458_s6, %s454_s30 }
  0xea   : > { %p456_p7 = pnand %p455_p6, %p580_p4 }
  0xeb   : > { %p461_p12 = por %p460_p11, %p459_p10 }
  0xec   : > { %p457_p9 = pneg %p456_p7 }
  0xee   : > { %p462_p13 = pnand %p461_p12, %p457_p9 }
  0xf0   : > { %465 = shalt.err (!%p462_p13)
}
  0xf1   : > { %383 = dma.vmem_to_hbm [thread:$0]  (%p580_p4), %s613_s18, 256, %s611_s23, %s273_s15  }
  0xf2 PF: > { %p389_p0 = scmp.ge.s32.totalorder %s516_s17, 2  ;;  %s301_s9 = sand.u32 1, %s496_s12  }
  0xf3   : > { %s302_s10 = scalar_lea.sflag [#allocation3], %s301_s9 }
  0xf4   : > { %p386_p1 = pnand %p389_p0, %p587_p8 }
  0xf6   : > { %p387_p2 = pneg %p386_p1 }
  0xf8   : > { %491 = dma.done.wait (%p387_p2), %s302_s10, 256  }
  0xf9   : > { %493 = vsyncadd (%p387_p2), %s302_s10, 4294967040  ;;  %s16_s17 = sadd.s32 1, %s516_s17   ;;  %s663_s12 = smov %s500_s13 }
  0xfa   : > { %p13_p3 = scmp.ge.s32.totalorder %s16_s17, 4   ;;  %s664_s13 = smov %s504_s14 }
  0xfb   : > { %s665_s14 = smov %s593_s25  ;;  %s666_s15 = smov %s512_s16 }
  0xfc   : > { %s667_s16 = smov %s669_s20  ;;  %15 = sbr.rel (!%p13_p3) target bundleno = 4 (0x4), region = 67 }
 0x101   :  { %307 = vsyncpa [#allocation3], 1 }
 0x102   :  { %309 = vsyncpa [#allocation3 + $0x1], 1 }

</bundles_post_ra>
